<compile_context>
chip_gen: v7x
topology: tpu7x:2x2x1
jax: 0.10.0
libtpu: 0.0.40
codegen_flags: <defaults>
</compile_context>

<pallas_src>
import jax
import jax.numpy as jnp
from jax import lax
from jax.experimental import pallas as pl
from jax.experimental.pallas import tpu as pltpu


def _round_up(x, m):
    return ((x + m - 1) // m) * m


def predictor_kernel(x_ref, wih_ref, whh_ref, bx_ref, bhn_ref,
                     wfc_ref, bfc_ref, out_ref, gx_ref):
    """Whole forward pass: hoisted input projection + GRU recurrence + FC head.

    x_ref   : (T*Bp, I)  bf16  time-major, batch-padded input
    wih_ref : (I, 128)   bf16  W_ih^T, gates r|z|n packed in lanes [0, 3H)
    whh_ref : (H, 128)   bf16  W_hh^T, same dense gate packing
    bx_ref  : (1, 128)   f32   folded bias [b_ir+b_hr | b_iz+b_hz | b_in | 0]
    bhn_ref : (1, H)     f32   b_hn (must stay inside r * (...))
    wfc_ref : (1, H)     f32   fc weight row
    bfc_ref : (1, 1)     f32   fc bias (SMEM scalar)
    out_ref : (Bp, 1)    f32   sigmoid(fc(h_last))
    gx_ref  : (T*Bp, 128) f32  VMEM scratch for the hoisted projection
    """
    TB, _ = x_ref.shape
    Bp = out_ref.shape[0]
    T = TB // Bp
    H = whh_ref.shape[0]                      # hidden dim (3*H <= 128)

    whh = whh_ref[...]                        # (H, 128) bf16, vreg-resident
    bhn_b = jnp.broadcast_to(bhn_ref[...], (Bp, H))   # hoisted broadcast

    # --- Hoisted, time-parallel input projection: one MXU matmul, staged
    # in VMEM so the unrolled loop reads one aligned (Bp, 128) slab per step.
    gx_ref[...] = jnp.dot(x_ref[...], wih_ref[...],
                          preferred_element_type=jnp.float32) + bx_ref[...]

    # --- Serial recurrence: one 128-lane MXU tile per step + gate math. ---
    h = jnp.zeros((Bp, H), jnp.float32)
    for t in range(T):                        # fully unrolled: T static & small
        gx_t = gx_ref[pl.ds(t * Bp, Bp), :]                       # (Bp, 128)
        gh = jnp.dot(h.astype(jnp.bfloat16), whh,
                     preferred_element_type=jnp.float32)          # (Bp, 128)
        a = gx_t + gh
        # sigmoid via tanh identity (single EUP op feeding the r->n chain).
        s = 0.5 * jnp.tanh(0.5 * a[:, :2 * H]) + 0.5              # (Bp, 2H)
        r = s[:, :H]
        z = s[:, H:2 * H]
        n = jnp.tanh(gx_t[:, 2 * H:3 * H] + r * (gh[:, 2 * H:3 * H] + bhn_b))
        h = n + z * (h - n)                   # == (1 - z) * n + z * h

    # --- FC head: VPU multiply + cross-lane reduce (no 1-lane MXU tile). ---
    logit = jnp.sum(h * wfc_ref[...], axis=-1, keepdims=True) + bfc_ref[0, 0]
    out_ref[...] = jax.nn.sigmoid(logit)


def init_params(key, input_size, hidden_dim):
    """Deterministic init mirroring PyTorch's U(-1/sqrt(H), 1/sqrt(H))."""
    k = 1.0 / jnp.sqrt(jnp.float32(hidden_dim))
    keys = jax.random.split(key, 6)
    u = lambda kk, shape: jax.random.uniform(kk, shape, jnp.float32, -k, k)
    return {
        "weight_ih": u(keys[0], (3 * hidden_dim, input_size)),  # gate order r,z,n
        "weight_hh": u(keys[1], (3 * hidden_dim, hidden_dim)),
        "bias_ih":   u(keys[2], (3 * hidden_dim,)),
        "bias_hh":   u(keys[3], (3 * hidden_dim,)),
        "fc_w":      u(keys[4], (1, hidden_dim)),
        "fc_b":      u(keys[5], (1,)),
    }


def predictor_forward(x, t, params):
    """x: (B, T, I) batch-first, like the PyTorch module. `t` is unused
    (the PyTorch forward ignores it). Returns (1, B, 1) float32."""
    del t
    B, T, I = x.shape
    H = params["weight_hh"].shape[1]
    G = 128                                   # packed gate lane width
    assert 3 * H <= G, "dense gate packing needs 3*H <= 128"
    Bp = _round_up(B, 8)                      # f32 sublane granule

    # Time-major, batch-padded input -> (T*Bp, I); each per-step gx slice in
    # the kernel is then a whole-vreg slab.  (Tiny XLA-side transpose.)
    x_tm = jnp.zeros((T, Bp, I), jnp.float32).at[:, :B, :].set(
        jnp.transpose(x.astype(jnp.float32), (1, 0, 2)))
    x_tm = x_tm.reshape(T * Bp, I).astype(jnp.bfloat16)

    wih = params["weight_ih"].astype(jnp.float32)   # (3H, I)
    whh = params["weight_hh"].astype(jnp.float32)   # (3H, H)
    bih = params["bias_ih"].astype(jnp.float32)     # (3H,)
    bhh = params["bias_hh"].astype(jnp.float32)     # (3H,)

    # Dense gate packing: r|z|n occupy lanes [0, 3H), zero-padded to 128.
    # bf16 MXU operands (accumulation stays f32 in-kernel).
    wih_p = jnp.zeros((I, G), jnp.float32).at[:, :3 * H].set(wih.T)
    whh_p = jnp.zeros((H, G), jnp.float32).at[:, :3 * H].set(whh.T)
    wih_p = wih_p.astype(jnp.bfloat16)
    whh_p = whh_p.astype(jnp.bfloat16)

    # Folded bias: r,z gates get b_ih + b_hh; n gate gets only b_in.
    bx = jnp.zeros((1, G), jnp.float32)
    bx = bx.at[0, :2 * H].set(bih[:2 * H] + bhh[:2 * H])
    bx = bx.at[0, 2 * H:3 * H].set(bih[2 * H:3 * H])
    bhn = bhh[2 * H:3 * H].reshape(1, H)      # b_hn stays inside r * (...)

    wfc = params["fc_w"].astype(jnp.float32).reshape(1, H)
    bfc = params["fc_b"].reshape(1, 1).astype(jnp.float32)

    vmem = pl.BlockSpec(memory_space=pltpu.MemorySpace.VMEM)
    smem = pl.BlockSpec(memory_space=pltpu.MemorySpace.SMEM)

    out_p = pl.pallas_call(
        predictor_kernel,
        out_shape=jax.ShapeDtypeStruct((Bp, 1), jnp.float32),
        in_specs=[vmem, vmem, vmem, vmem, vmem, vmem, smem],
        out_specs=vmem,
        scratch_shapes=[pltpu.VMEM((T * Bp, G), jnp.float32)],
    )(x_tm, wih_p, whh_p, bx, bhn, wfc, bfc)

    return out_p[:B].reshape(1, B, 1)


def predictor_reference(x, params):
    """Pure-JAX f32 reference of the PyTorch forward for verification."""
    B, T, I = x.shape
    H = params["weight_hh"].shape[1]
    wih_t = params["weight_ih"].T
    whh_t = params["weight_hh"].T
    bih = params["bias_ih"]
    bhh = params["bias_hh"]

    def step(h, x_t):
        gx = x_t @ wih_t + bih
        gh = h @ whh_t + bhh
        r = jax.nn.sigmoid(gx[:, 0:H] + gh[:, 0:H])
        z = jax.nn.sigmoid(gx[:, H:2 * H] + gh[:, H:2 * H])
        n = jnp.tanh(gx[:, 2 * H:3 * H] + r * gh[:, 2 * H:3 * H])
        h_new = (1.0 - z) * n + z * h
        return h_new, None

    h0 = jnp.zeros((B, H), jnp.float32)
    h_last, _ = lax.scan(step, h0, jnp.transpose(x, (1, 0, 2)))
    logit = h_last @ params["fc_w"].T + params["fc_b"]
    return jax.nn.sigmoid(logit).reshape(1, B, 1)


if __name__ == "__main__":
    B, T, I, H = 4, 8, 8, 32   # batch, seq_len, input_size, hidden_dim

    key = jax.random.PRNGKey(0)
    kx, kp = jax.random.split(key)
    x = jax.random.normal(kx, (B, T, I), jnp.float32)
    t = jnp.full((B,), T, jnp.int32)   # ignored by forward, as in PyTorch
    params = init_params(kp, I, H)

    y_hat = predictor_forward(x, t, params)
    jax.block_until_ready(y_hat)

    y_ref = predictor_reference(x, params)
    assert y_hat.shape == (1, B, 1)
    # bf16 MXU operands (f32 accumulation / gate math) -> loosened tolerance
    # vs. the pure-f32 reference, per the performance review.
    assert jnp.allclose(y_hat, y_ref, atol=3e-2, rtol=3e-2), "mismatch vs reference"

    print("KERNEL_OK")
</pallas_src>

<mosaic_0001>
module attributes {stable_mosaic.version = 11 : i64} {
  func.func @predictor_kernel(%arg0: memref<64x8xbf16, #tpu.memory_space<vmem>>, %arg1: memref<8x128xbf16, #tpu.memory_space<vmem>>, %arg2: memref<32x128xbf16, #tpu.memory_space<vmem>>, %arg3: memref<1x128xf32, #tpu.memory_space<vmem>>, %arg4: memref<1x32xf32, #tpu.memory_space<vmem>>, %arg5: memref<1x32xf32, #tpu.memory_space<vmem>>, %arg6: memref<1x1xf32, #tpu.memory_space<smem>>, %arg7: memref<8x1xf32, #tpu.memory_space<vmem>>, %arg8: memref<64x128xf32, #tpu.memory_space<vmem>>) attributes {dimension_semantics = [], scalar_prefetch = 0 : i64, scratch_operands = 1 : i64, tpu.core_type = #tpu.core_type<tc>} {
    %c0 = arith.constant 0 : index
    %c0_0 = arith.constant 0 : index
    %0 = vector.load %arg2[%c0, %c0_0] : memref<32x128xbf16, #tpu.memory_space<vmem>>, vector<32x128xbf16>
    %c0_1 = arith.constant 0 : index
    %c0_2 = arith.constant 0 : index
    %1 = vector.load %arg4[%c0_1, %c0_2] : memref<1x32xf32, #tpu.memory_space<vmem>>, vector<1x32xf32>
    %2 = vector.shape_cast %1 : vector<1x32xf32> to vector<1x32xf32>
    %3 = vector.broadcast %2 : vector<1x32xf32> to vector<8x32xf32>
    %c0_3 = arith.constant 0 : index
    %c0_4 = arith.constant 0 : index
    %4 = vector.load %arg0[%c0_3, %c0_4] : memref<64x8xbf16, #tpu.memory_space<vmem>>, vector<64x8xbf16>
    %c0_5 = arith.constant 0 : index
    %c0_6 = arith.constant 0 : index
    %5 = vector.load %arg1[%c0_5, %c0_6] : memref<8x128xbf16, #tpu.memory_space<vmem>>, vector<8x128xbf16>
    %cst = arith.constant dense<0.000000e+00> : vector<64x128xf32>
    %6 = tpu.matmul %4, %5, %cst {dimension_numbers = #tpu.dot_dimension_numbers<[1], [0], [0], [1], [0, 0, 1, 1], [], []>} : vector<64x8xbf16>, vector<8x128xbf16>, vector<64x128xf32> -> vector<64x128xf32>
    %c0_7 = arith.constant 0 : index
    %c0_8 = arith.constant 0 : index
    %7 = vector.load %arg3[%c0_7, %c0_8] : memref<1x128xf32, #tpu.memory_space<vmem>>, vector<1x128xf32>
    %8 = vector.broadcast %7 : vector<1x128xf32> to vector<64x128xf32>
    %9 = arith.addf %6, %8 : vector<64x128xf32>
    %c0_9 = arith.constant 0 : index
    %c0_10 = arith.constant 0 : index
    %10 = vector.load %arg8[%c0_9, %c0_10] : memref<64x128xf32, #tpu.memory_space<vmem>>, vector<64x128xf32>
    tpu.vector_store %arg8[%c0_9, %c0_10], %9 {strides = array<i32>} : memref<64x128xf32, #tpu.memory_space<vmem>>, vector<64x128xf32>,
    %cst_11 = arith.constant 0.000000e+00 : f32
    %11 = vector.broadcast %cst_11 : f32 to vector<8x32xf32>
    %c0_12 = arith.constant 0 : index
    %c0_13 = arith.constant 0 : index
    %12 = vector.load %arg8[%c0_12, %c0_13] : memref<64x128xf32, #tpu.memory_space<vmem>>, vector<8x128xf32>
    %13 = arith.truncf %11 : vector<8x32xf32> to vector<8x32xbf16>
    %cst_14 = arith.constant dense<0.000000e+00> : vector<8x128xf32>
    %14 = tpu.matmul %13, %0, %cst_14 {dimension_numbers = #tpu.dot_dimension_numbers<[1], [0], [0], [1], [0, 0, 1, 1], [], []>} : vector<8x32xbf16>, vector<32x128xbf16>, vector<8x128xf32> -> vector<8x128xf32>
    %15 = arith.addf %12, %14 : vector<8x128xf32>
    %16 = vector.extract_strided_slice %15 {offsets = [0, 0], sizes = [8, 64], strides = [1, 1]} : vector<8x128xf32> to vector<8x64xf32>
    %cst_15 = arith.constant 5.000000e-01 : f32
    %17 = vector.broadcast %cst_15 : f32 to vector<8x64xf32>
    %18 = arith.mulf %17, %16 : vector<8x64xf32>
    %19 = math.tanh %18 : vector<8x64xf32>
    %cst_16 = arith.constant 5.000000e-01 : f32
    %20 = vector.broadcast %cst_16 : f32 to vector<8x64xf32>
    %21 = arith.mulf %20, %19 : vector<8x64xf32>
    %cst_17 = arith.constant 5.000000e-01 : f32
    %22 = vector.broadcast %cst_17 : f32 to vector<8x64xf32>
    %23 = arith.addf %21, %22 : vector<8x64xf32>
    %24 = vector.extract_strided_slice %23 {offsets = [0, 0], sizes = [8, 32], strides = [1, 1]} : vector<8x64xf32> to vector<8x32xf32>
    %25 = vector.extract_strided_slice %23 {offsets = [0, 32], sizes = [8, 32], strides = [1, 1]} : vector<8x64xf32> to vector<8x32xf32>
    %26 = vector.extract_strided_slice %12 {offsets = [0, 64], sizes = [8, 32], strides = [1, 1]} : vector<8x128xf32> to vector<8x32xf32>
    %27 = vector.extract_strided_slice %14 {offsets = [0, 64], sizes = [8, 32], strides = [1, 1]} : vector<8x128xf32> to vector<8x32xf32>
    %28 = arith.addf %27, %3 : vector<8x32xf32>
    %29 = arith.mulf %24, %28 : vector<8x32xf32>
    %30 = arith.addf %26, %29 : vector<8x32xf32>
    %31 = math.tanh %30 : vector<8x32xf32>
    %32 = arith.subf %11, %31 : vector<8x32xf32>
    %33 = arith.mulf %25, %32 : vector<8x32xf32>
    %34 = arith.addf %31, %33 : vector<8x32xf32>
    %c8 = arith.constant 8 : index
    %c0_18 = arith.constant 0 : index
    %35 = vector.load %arg8[%c8, %c0_18] : memref<64x128xf32, #tpu.memory_space<vmem>>, vector<8x128xf32>
    %36 = arith.truncf %34 : vector<8x32xf32> to vector<8x32xbf16>
    %cst_19 = arith.constant dense<0.000000e+00> : vector<8x128xf32>
    %37 = tpu.matmul %36, %0, %cst_19 {dimension_numbers = #tpu.dot_dimension_numbers<[1], [0], [0], [1], [0, 0, 1, 1], [], []>} : vector<8x32xbf16>, vector<32x128xbf16>, vector<8x128xf32> -> vector<8x128xf32>
    %38 = arith.addf %35, %37 : vector<8x128xf32>
    %39 = vector.extract_strided_slice %38 {offsets = [0, 0], sizes = [8, 64], strides = [1, 1]} : vector<8x128xf32> to vector<8x64xf32>
    %cst_20 = arith.constant 5.000000e-01 : f32
    %40 = vector.broadcast %cst_20 : f32 to vector<8x64xf32>
    %41 = arith.mulf %40, %39 : vector<8x64xf32>
    %42 = math.tanh %41 : vector<8x64xf32>
    %cst_21 = arith.constant 5.000000e-01 : f32
    %43 = vector.broadcast %cst_21 : f32 to vector<8x64xf32>
    %44 = arith.mulf %43, %42 : vector<8x64xf32>
    %cst_22 = arith.constant 5.000000e-01 : f32
    %45 = vector.broadcast %cst_22 : f32 to vector<8x64xf32>
    %46 = arith.addf %44, %45 : vector<8x64xf32>
    %47 = vector.extract_strided_slice %46 {offsets = [0, 0], sizes = [8, 32], strides = [1, 1]} : vector<8x64xf32> to vector<8x32xf32>
    %48 = vector.extract_strided_slice %46 {offsets = [0, 32], sizes = [8, 32], strides = [1, 1]} : vector<8x64xf32> to vector<8x32xf32>
    %49 = vector.extract_strided_slice %35 {offsets = [0, 64], sizes = [8, 32], strides = [1, 1]} : vector<8x128xf32> to vector<8x32xf32>
    %50 = vector.extract_strided_slice %37 {offsets = [0, 64], sizes = [8, 32], strides = [1, 1]} : vector<8x128xf32> to vector<8x32xf32>
    %51 = arith.addf %50, %3 : vector<8x32xf32>
    %52 = arith.mulf %47, %51 : vector<8x32xf32>
    %53 = arith.addf %49, %52 : vector<8x32xf32>
    %54 = math.tanh %53 : vector<8x32xf32>
    %55 = arith.subf %34, %54 : vector<8x32xf32>
    %56 = arith.mulf %48, %55 : vector<8x32xf32>
    %57 = arith.addf %54, %56 : vector<8x32xf32>
    %c16 = arith.constant 16 : index
    %c0_23 = arith.constant 0 : index
    %58 = vector.load %arg8[%c16, %c0_23] : memref<64x128xf32, #tpu.memory_space<vmem>>, vector<8x128xf32>
    %59 = arith.truncf %57 : vector<8x32xf32> to vector<8x32xbf16>
    %cst_24 = arith.constant dense<0.000000e+00> : vector<8x128xf32>
    %60 = tpu.matmul %59, %0, %cst_24 {dimension_numbers = #tpu.dot_dimension_numbers<[1], [0], [0], [1], [0, 0, 1, 1], [], []>} : vector<8x32xbf16>, vector<32x128xbf16>, vector<8x128xf32> -> vector<8x128xf32>
    %61 = arith.addf %58, %60 : vector<8x128xf32>
    %62 = vector.extract_strided_slice %61 {offsets = [0, 0], sizes = [8, 64], strides = [1, 1]} : vector<8x128xf32> to vector<8x64xf32>
    %cst_25 = arith.constant 5.000000e-01 : f32
    %63 = vector.broadcast %cst_25 : f32 to vector<8x64xf32>
    %64 = arith.mulf %63, %62 : vector<8x64xf32>
    %65 = math.tanh %64 : vector<8x64xf32>
    %cst_26 = arith.constant 5.000000e-01 : f32
    %66 = vector.broadcast %cst_26 : f32 to vector<8x64xf32>
    %67 = arith.mulf %66, %65 : vector<8x64xf32>
    %cst_27 = arith.constant 5.000000e-01 : f32
    %68 = vector.broadcast %cst_27 : f32 to vector<8x64xf32>
    %69 = arith.addf %67, %68 : vector<8x64xf32>
    %70 = vector.extract_strided_slice %69 {offsets = [0, 0], sizes = [8, 32], strides = [1, 1]} : vector<8x64xf32> to vector<8x32xf32>
    %71 = vector.extract_strided_slice %69 {offsets = [0, 32], sizes = [8, 32], strides = [1, 1]} : vector<8x64xf32> to vector<8x32xf32>
    %72 = vector.extract_strided_slice %58 {offsets = [0, 64], sizes = [8, 32], strides = [1, 1]} : vector<8x128xf32> to vector<8x32xf32>
    %73 = vector.extract_strided_slice %60 {offsets = [0, 64], sizes = [8, 32], strides = [1, 1]} : vector<8x128xf32> to vector<8x32xf32>
    %74 = arith.addf %73, %3 : vector<8x32xf32>
    %75 = arith.mulf %70, %74 : vector<8x32xf32>
    %76 = arith.addf %72, %75 : vector<8x32xf32>
    %77 = math.tanh %76 : vector<8x32xf32>
    %78 = arith.subf %57, %77 : vector<8x32xf32>
    %79 = arith.mulf %71, %78 : vector<8x32xf32>
    %80 = arith.addf %77, %79 : vector<8x32xf32>
    %c24 = arith.constant 24 : index
    %c0_28 = arith.constant 0 : index
    %81 = vector.load %arg8[%c24, %c0_28] : memref<64x128xf32, #tpu.memory_space<vmem>>, vector<8x128xf32>
    %82 = arith.truncf %80 : vector<8x32xf32> to vector<8x32xbf16>
    %cst_29 = arith.constant dense<0.000000e+00> : vector<8x128xf32>
    %83 = tpu.matmul %82, %0, %cst_29 {dimension_numbers = #tpu.dot_dimension_numbers<[1], [0], [0], [1], [0, 0, 1, 1], [], []>} : vector<8x32xbf16>, vector<32x128xbf16>, vector<8x128xf32> -> vector<8x128xf32>
    %84 = arith.addf %81, %83 : vector<8x128xf32>
    %85 = vector.extract_strided_slice %84 {offsets = [0, 0], sizes = [8, 64], strides = [1, 1]} : vector<8x128xf32> to vector<8x64xf32>
    %cst_30 = arith.constant 5.000000e-01 : f32
    %86 = vector.broadcast %cst_30 : f32 to vector<8x64xf32>
    %87 = arith.mulf %86, %85 : vector<8x64xf32>
    %88 = math.tanh %87 : vector<8x64xf32>
    %cst_31 = arith.constant 5.000000e-01 : f32
    %89 = vector.broadcast %cst_31 : f32 to vector<8x64xf32>
    %90 = arith.mulf %89, %88 : vector<8x64xf32>
    %cst_32 = arith.constant 5.000000e-01 : f32
    %91 = vector.broadcast %cst_32 : f32 to vector<8x64xf32>
    %92 = arith.addf %90, %91 : vector<8x64xf32>
    %93 = vector.extract_strided_slice %92 {offsets = [0, 0], sizes = [8, 32], strides = [1, 1]} : vector<8x64xf32> to vector<8x32xf32>
    %94 = vector.extract_strided_slice %92 {offsets = [0, 32], sizes = [8, 32], strides = [1, 1]} : vector<8x64xf32> to vector<8x32xf32>
    %95 = vector.extract_strided_slice %81 {offsets = [0, 64], sizes = [8, 32], strides = [1, 1]} : vector<8x128xf32> to vector<8x32xf32>
    %96 = vector.extract_strided_slice %83 {offsets = [0, 64], sizes = [8, 32], strides = [1, 1]} : vector<8x128xf32> to vector<8x32xf32>
    %97 = arith.addf %96, %3 : vector<8x32xf32>
    %98 = arith.mulf %93, %97 : vector<8x32xf32>
    %99 = arith.addf %95, %98 : vector<8x32xf32>
    %100 = math.tanh %99 : vector<8x32xf32>
    %101 = arith.subf %80, %100 : vector<8x32xf32>
    %102 = arith.mulf %94, %101 : vector<8x32xf32>
    %103 = arith.addf %100, %102 : vector<8x32xf32>
    %c32 = arith.constant 32 : index
    %c0_33 = arith.constant 0 : index
    %104 = vector.load %arg8[%c32, %c0_33] : memref<64x128xf32, #tpu.memory_space<vmem>>, vector<8x128xf32>
    %105 = arith.truncf %103 : vector<8x32xf32> to vector<8x32xbf16>
    %cst_34 = arith.constant dense<0.000000e+00> : vector<8x128xf32>
    %106 = tpu.matmul %105, %0, %cst_34 {dimension_numbers = #tpu.dot_dimension_numbers<[1], [0], [0], [1], [0, 0, 1, 1], [], []>} : vector<8x32xbf16>, vector<32x128xbf16>, vector<8x128xf32> -> vector<8x128xf32>
    %107 = arith.addf %104, %106 : vector<8x128xf32>
    %108 = vector.extract_strided_slice %107 {offsets = [0, 0], sizes = [8, 64], strides = [1, 1]} : vector<8x128xf32> to vector<8x64xf32>
    %cst_35 = arith.constant 5.000000e-01 : f32
    %109 = vector.broadcast %cst_35 : f32 to vector<8x64xf32>
    %110 = arith.mulf %109, %108 : vector<8x64xf32>
    %111 = math.tanh %110 : vector<8x64xf32>
    %cst_36 = arith.constant 5.000000e-01 : f32
    %112 = vector.broadcast %cst_36 : f32 to vector<8x64xf32>
    %113 = arith.mulf %112, %111 : vector<8x64xf32>
    %cst_37 = arith.constant 5.000000e-01 : f32
    %114 = vector.broadcast %cst_37 : f32 to vector<8x64xf32>
    %115 = arith.addf %113, %114 : vector<8x64xf32>
    %116 = vector.extract_strided_slice %115 {offsets = [0, 0], sizes = [8, 32], strides = [1, 1]} : vector<8x64xf32> to vector<8x32xf32>
    %117 = vector.extract_strided_slice %115 {offsets = [0, 32], sizes = [8, 32], strides = [1, 1]} : vector<8x64xf32> to vector<8x32xf32>
    %118 = vector.extract_strided_slice %104 {offsets = [0, 64], sizes = [8, 32], strides = [1, 1]} : vector<8x128xf32> to vector<8x32xf32>
    %119 = vector.extract_strided_slice %106 {offsets = [0, 64], sizes = [8, 32], strides = [1, 1]} : vector<8x128xf32> to vector<8x32xf32>
    %120 = arith.addf %119, %3 : vector<8x32xf32>
    %121 = arith.mulf %116, %120 : vector<8x32xf32>
    %122 = arith.addf %118, %121 : vector<8x32xf32>
    %123 = math.tanh %122 : vector<8x32xf32>
    %124 = arith.subf %103, %123 : vector<8x32xf32>
    %125 = arith.mulf %117, %124 : vector<8x32xf32>
    %126 = arith.addf %123, %125 : vector<8x32xf32>
    %c40 = arith.constant 40 : index
    %c0_38 = arith.constant 0 : index
    %127 = vector.load %arg8[%c40, %c0_38] : memref<64x128xf32, #tpu.memory_space<vmem>>, vector<8x128xf32>
    %128 = arith.truncf %126 : vector<8x32xf32> to vector<8x32xbf16>
    %cst_39 = arith.constant dense<0.000000e+00> : vector<8x128xf32>
    %129 = tpu.matmul %128, %0, %cst_39 {dimension_numbers = #tpu.dot_dimension_numbers<[1], [0], [0], [1], [0, 0, 1, 1], [], []>} : vector<8x32xbf16>, vector<32x128xbf16>, vector<8x128xf32> -> vector<8x128xf32>
    %130 = arith.addf %127, %129 : vector<8x128xf32>
    %131 = vector.extract_strided_slice %130 {offsets = [0, 0], sizes = [8, 64], strides = [1, 1]} : vector<8x128xf32> to vector<8x64xf32>
    %cst_40 = arith.constant 5.000000e-01 : f32
    %132 = vector.broadcast %cst_40 : f32 to vector<8x64xf32>
    %133 = arith.mulf %132, %131 : vector<8x64xf32>
    %134 = math.tanh %133 : vector<8x64xf32>
    %cst_41 = arith.constant 5.000000e-01 : f32
    %135 = vector.broadcast %cst_41 : f32 to vector<8x64xf32>
    %136 = arith.mulf %135, %134 : vector<8x64xf32>
    %cst_42 = arith.constant 5.000000e-01 : f32
    %137 = vector.broadcast %cst_42 : f32 to vector<8x64xf32>
    %138 = arith.addf %136, %137 : vector<8x64xf32>
    %139 = vector.extract_strided_slice %138 {offsets = [0, 0], sizes = [8, 32], strides = [1, 1]} : vector<8x64xf32> to vector<8x32xf32>
    %140 = vector.extract_strided_slice %138 {offsets = [0, 32], sizes = [8, 32], strides = [1, 1]} : vector<8x64xf32> to vector<8x32xf32>
    %141 = vector.extract_strided_slice %127 {offsets = [0, 64], sizes = [8, 32], strides = [1, 1]} : vector<8x128xf32> to vector<8x32xf32>
    %142 = vector.extract_strided_slice %129 {offsets = [0, 64], sizes = [8, 32], strides = [1, 1]} : vector<8x128xf32> to vector<8x32xf32>
    %143 = arith.addf %142, %3 : vector<8x32xf32>
    %144 = arith.mulf %139, %143 : vector<8x32xf32>
    %145 = arith.addf %141, %144 : vector<8x32xf32>
    %146 = math.tanh %145 : vector<8x32xf32>
    %147 = arith.subf %126, %146 : vector<8x32xf32>
    %148 = arith.mulf %140, %147 : vector<8x32xf32>
    %149 = arith.addf %146, %148 : vector<8x32xf32>
    %c48 = arith.constant 48 : index
    %c0_43 = arith.constant 0 : index
    %150 = vector.load %arg8[%c48, %c0_43] : memref<64x128xf32, #tpu.memory_space<vmem>>, vector<8x128xf32>
    %151 = arith.truncf %149 : vector<8x32xf32> to vector<8x32xbf16>
    %cst_44 = arith.constant dense<0.000000e+00> : vector<8x128xf32>
    %152 = tpu.matmul %151, %0, %cst_44 {dimension_numbers = #tpu.dot_dimension_numbers<[1], [0], [0], [1], [0, 0, 1, 1], [], []>} : vector<8x32xbf16>, vector<32x128xbf16>, vector<8x128xf32> -> vector<8x128xf32>
    %153 = arith.addf %150, %152 : vector<8x128xf32>
    %154 = vector.extract_strided_slice %153 {offsets = [0, 0], sizes = [8, 64], strides = [1, 1]} : vector<8x128xf32> to vector<8x64xf32>
    %cst_45 = arith.constant 5.000000e-01 : f32
    %155 = vector.broadcast %cst_45 : f32 to vector<8x64xf32>
    %156 = arith.mulf %155, %154 : vector<8x64xf32>
    %157 = math.tanh %156 : vector<8x64xf32>
    %cst_46 = arith.constant 5.000000e-01 : f32
    %158 = vector.broadcast %cst_46 : f32 to vector<8x64xf32>
    %159 = arith.mulf %158, %157 : vector<8x64xf32>
    %cst_47 = arith.constant 5.000000e-01 : f32
    %160 = vector.broadcast %cst_47 : f32 to vector<8x64xf32>
    %161 = arith.addf %159, %160 : vector<8x64xf32>
    %162 = vector.extract_strided_slice %161 {offsets = [0, 0], sizes = [8, 32], strides = [1, 1]} : vector<8x64xf32> to vector<8x32xf32>
    %163 = vector.extract_strided_slice %161 {offsets = [0, 32], sizes = [8, 32], strides = [1, 1]} : vector<8x64xf32> to vector<8x32xf32>
    %164 = vector.extract_strided_slice %150 {offsets = [0, 64], sizes = [8, 32], strides = [1, 1]} : vector<8x128xf32> to vector<8x32xf32>
    %165 = vector.extract_strided_slice %152 {offsets = [0, 64], sizes = [8, 32], strides = [1, 1]} : vector<8x128xf32> to vector<8x32xf32>
    %166 = arith.addf %165, %3 : vector<8x32xf32>
    %167 = arith.mulf %162, %166 : vector<8x32xf32>
    %168 = arith.addf %164, %167 : vector<8x32xf32>
    %169 = math.tanh %168 : vector<8x32xf32>
    %170 = arith.subf %149, %169 : vector<8x32xf32>
    %171 = arith.mulf %163, %170 : vector<8x32xf32>
    %172 = arith.addf %169, %171 : vector<8x32xf32>
    %c56 = arith.constant 56 : index
    %c0_48 = arith.constant 0 : index
    %173 = vector.load %arg8[%c56, %c0_48] : memref<64x128xf32, #tpu.memory_space<vmem>>, vector<8x128xf32>
    %174 = arith.truncf %172 : vector<8x32xf32> to vector<8x32xbf16>
    %cst_49 = arith.constant dense<0.000000e+00> : vector<8x128xf32>
    %175 = tpu.matmul %174, %0, %cst_49 {dimension_numbers = #tpu.dot_dimension_numbers<[1], [0], [0], [1], [0, 0, 1, 1], [], []>} : vector<8x32xbf16>, vector<32x128xbf16>, vector<8x128xf32> -> vector<8x128xf32>
    %176 = arith.addf %173, %175 : vector<8x128xf32>
    %177 = vector.extract_strided_slice %176 {offsets = [0, 0], sizes = [8, 64], strides = [1, 1]} : vector<8x128xf32> to vector<8x64xf32>
    %cst_50 = arith.constant 5.000000e-01 : f32
    %178 = vector.broadcast %cst_50 : f32 to vector<8x64xf32>
    %179 = arith.mulf %178, %177 : vector<8x64xf32>
    %180 = math.tanh %179 : vector<8x64xf32>
    %cst_51 = arith.constant 5.000000e-01 : f32
    %181 = vector.broadcast %cst_51 : f32 to vector<8x64xf32>
    %182 = arith.mulf %181, %180 : vector<8x64xf32>
    %cst_52 = arith.constant 5.000000e-01 : f32
    %183 = vector.broadcast %cst_52 : f32 to vector<8x64xf32>
    %184 = arith.addf %182, %183 : vector<8x64xf32>
    %185 = vector.extract_strided_slice %184 {offsets = [0, 0], sizes = [8, 32], strides = [1, 1]} : vector<8x64xf32> to vector<8x32xf32>
    %186 = vector.extract_strided_slice %184 {offsets = [0, 32], sizes = [8, 32], strides = [1, 1]} : vector<8x64xf32> to vector<8x32xf32>
    %187 = vector.extract_strided_slice %173 {offsets = [0, 64], sizes = [8, 32], strides = [1, 1]} : vector<8x128xf32> to vector<8x32xf32>
    %188 = vector.extract_strided_slice %175 {offsets = [0, 64], sizes = [8, 32], strides = [1, 1]} : vector<8x128xf32> to vector<8x32xf32>
    %189 = arith.addf %188, %3 : vector<8x32xf32>
    %190 = arith.mulf %185, %189 : vector<8x32xf32>
    %191 = arith.addf %187, %190 : vector<8x32xf32>
    %192 = math.tanh %191 : vector<8x32xf32>
    %193 = arith.subf %172, %192 : vector<8x32xf32>
    %194 = arith.mulf %186, %193 : vector<8x32xf32>
    %195 = arith.addf %192, %194 : vector<8x32xf32>
    %c0_53 = arith.constant 0 : index
    %c0_54 = arith.constant 0 : index
    %196 = vector.load %arg5[%c0_53, %c0_54] : memref<1x32xf32, #tpu.memory_space<vmem>>, vector<1x32xf32>
    %197 = vector.broadcast %196 : vector<1x32xf32> to vector<8x32xf32>
    %198 = arith.mulf %195, %197 : vector<8x32xf32>
    %cst_55 = arith.constant dense<0.000000e+00> : vector<8xf32>
    %199 = vector.multi_reduction <add>, %198, %cst_55 [1] : vector<8x32xf32> to vector<8xf32>
    %200 = vector.shape_cast %199 : vector<8xf32> to vector<8x1xf32>
    %c0_56 = arith.constant 0 : index
    %c0_57 = arith.constant 0 : index
    %201 = memref.load %arg6[%c0_56, %c0_57] : memref<1x1xf32, #tpu.memory_space<smem>>
    %202 = vector.broadcast %201 : f32 to vector<8x1xf32>
    %203 = arith.addf %200, %202 : vector<8x1xf32>
    %204 = arith.negf %203 : vector<8x1xf32>
    %205 = math.exp %204 : vector<8x1xf32>
    %cst_58 = arith.constant 1.000000e+00 : f32
    %206 = vector.broadcast %cst_58 : f32 to vector<8x1xf32>
    %207 = arith.addf %206, %205 : vector<8x1xf32>
    %208 = arith.divf %206, %207 : vector<8x1xf32>
    %c0_59 = arith.constant 0 : index
    %c0_60 = arith.constant 0 : index
    %209 = vector.load %arg7[%c0_59, %c0_60] : memref<8x1xf32, #tpu.memory_space<vmem>>, vector<8x1xf32>
    tpu.vector_store %arg7[%c0_59, %c0_60], %208 {strides = array<i32>} : memref<8x1xf32, #tpu.memory_space<vmem>>, vector<8x1xf32>,
    return
  }
}

</mosaic_0001>

<bundles_post_ra>
// kernel: tpu_custom_call.1
= control target key start
LH: loop header
LB: loop body
LE: loop exit
PB: predicated region body
PF: predicated region fallthrough
CT: control target
= control target key end

     0   :  { %vm87_vm0 = vcmask 1043456   ;;  %vm74_vm1 = vcmask 64512   ;;  %v989_v0 = vmov 0.0   ;;  %vm990_vm2 = vmmov 0   ;;  %s991_s12 = smov 64   ;;  %s993_s13 = smov 96   ;;  %s1215_s1 = inlined_call_operand.vmem [shape: bf16[8,128], index: 1, kind: input, shape index: {}]   ;;  %s1216_s2 = inlined_call_operand.vmem [shape: bf16[32,128], index: 2, kind: input, shape index: {}]   ;;  %s1217_s0 = inlined_call_operand.vmem [shape: bf16[64,8], index: 0, kind: input, shape index: {}]   ;;  %s1218_s4 = inlined_call_operand.vmem [shape: f32[1,32], index: 4, kind: input, shape index: {}]   ;;  %s1219_s3 = inlined_call_operand.vmem [shape: f32[1,128], index: 3, kind: input, shape index: {}]   ;;  %s1220_s5 = inlined_call_operand.vmem [shape: f32[1,32], index: 5, kind: input, shape index: {}]   ;;  %s1221_s6 = inlined_call_operand.<no memory space> [shape: f32[1,1], index: 6, kind: input, shape index: {}]   ;;  %s1222_s7 = inlined_call_operand.vmem [shape: f32[8,1], index: 7, kind: output, shape index: {}]  }
   0x1   :  { %876 = vmatprep.subr.bf16.mxu1 %v989_v0  ;;  %v46_v1 = vld [vmem:[%s1215_s1] sm:$0xf]  ;;  %880 = vmatprep.mubr.msk.bf16.mxu1 %vm990_vm2, %v989_v0  ;;  %v949_v5 = vld [vmem:[%s1217_s0 + $0x8] sm:$0xff]   ;;  %v992_v8 = vmov 0   ;;  %vm177_vm3 = vcmask 261120   ;;  %v951_v55 = vld [vmem:[%s1217_s0 + $0x10] sm:$0xff]  }
   0x2   :  { %940 = vmatprep.subr.msk.bf16.mxu0 %vm87_vm0, %v46_v1  ;;  %v1044_v2 = vld [vmem:[%s1216_s2] sm:$0xff]   ;;  %v89_v3 = vsel %vm87_vm0, %v46_v1, 0  ;;  %v1059_v6 = vld [vmem:[%s1216_s2 + $0x8] sm:$0xff]   ;;  %v952_v56 = vld [vmem:[%s1217_s0 + $0x18] sm:$0xff]   ;;  %vm810_vm4 = vcmask 7168  }
   0x3   :  { %867 = vmatpush3.bf16.msra.mxu0 %v89_v3  ;;  %v948_v4 = vld [vmem:[%s1217_s0] sm:$0xff]   ;;  %877 = vmatpush3.bf16.msra.mxu1 %v1044_v2 }
   0x4   :  { %892 = vmatprep.subr.bf16.mxu0 %v989_v0  ;;  %868 = vmatprep.mubr.msk.bf16.mxu0 %vm74_vm1, %v948_v4  ;;  %v816_v7 = vld [vmem:[%s1218_s4] ss:$0 sm:$0xff] }
   0x5   :  { %878 = vmatprep.subr.bf16.mxu1 %v989_v0  ;;  %226 = vrot.lane.b32.xlu0 %v816_v7, %s991_s12  ;;  %v1089_v19 = vld [vmem:[%s1219_s3] ss:$0 sm:$0xff]  ;;  %s994_s3 = smov 32  }
   0x6   :  { %869 = vmatmul.mubr.msk.bf16.vlgmr.msra.gmra.mrb[0].mxu0 %vm74_vm1, %v949_v5 }
   0x7   :  { %893 = vmatpush3.bf16.msra.mxu0 %v1044_v2  ;;  %879 = vmatpush3.bf16.msra.mxu1 %v1059_v6 }
   0x8   :  { %894 = vmatprep.subr.bf16.mxu0 %v989_v0  ;;  %884 = vmatprep.subr.bf16.mxu1 %v989_v0 }
   0x9   :  { %872 = vmatprep.mubr.msk.bf16.mxu0 %vm74_vm1, %v951_v55 }
   0xa   :  { %881 = vmatmul.mubr.bf16.vlgmr.msra.gmra.mrb[0].mxu1 %v992_v8 }
   0xb   :  { %895 = vmatpush3.bf16.msra.mxu0 %v1059_v6  ;;  %885 = vmatpush3.bf16.msra.mxu1 %v1044_v2 }
   0xc   :  { %888 = vmatprep.mubr.msk.bf16.mxu1 %vm990_vm2, %v989_v0  ;;  %886 = vmatprep.subr.bf16.mxu1 %v989_v0 }
   0xd   :  { %908 = vmatprep.subr.bf16.mxu0 %v989_v0 }
   0xe   :  { %873 = vmatmul.mubr.msk.bf16.gmra.mrb[4].mxu0 %vm74_vm1, %v952_v56 }
   0xf   :  { %887 = vmatpush3.bf16.msra.mxu1 %v1059_v6  ;;  %896 = vmatprep.mubr.msk.bf16.mxu0 %vm990_vm2, %v989_v0 }
  0x10   :  { %900 = vmatprep.subr.bf16.mxu1 %v989_v0 }
  0x77   :  { %v1082_v12 = vpop.permute.xlu0 %226 }
  0xd9   :  { %v1078_v9 = vpop.f32.mrb[0].mxu0 }
  0xda   :  { %v125_v10 = vpop.f32.mrb[1].mxu0 }
  0xdb   :  { %v1080_v11 = vpop.f32.mrb[2].mxu0  ;;  %v126_v20 = vadd.f32 %v1089_v19, %v125_v10 }
  0xdc   :  { %v128_v13 = vpop.f32.mrb[3].mxu0 }
  0xdd   :  { %v215_v14 = vpop.f32.mrb[0].mxu1  ;;  %v129_v43 = vadd.f32 %v1089_v19, %v128_v13 }
  0xde   :  { %v229_v15 = vadd.f32 %v1082_v12, %v215_v14  ;;  %v882_v16 = vpop.f32.mrb[1].mxu1  ;;  %v221_v21 = vadd.f32 %v215_v14, %v126_v20  ;;  %v134_v14 = vadd.f32 %v1078_v9, %v1089_v19 }
  0xdf   :  { %v218_v17 = vpop.f32.mrb[2].mxu1 }
  0xe0   :  { %231 = vrot.lane.b32.xlu0 %v229_v15, %s991_s12  ;;  %v883_v18 = vpop.f32.mrb[3].mxu1  ;;  %v222_v22 = vmul.f32 0.5, %v221_v21 }
  0xe1   :  { %v1120_v62 = vpop.f32.mrb[4].mxu0 }
  0xe2   :  { %953 = vtanh.f32 %v222_v22  ;;  %v1122_v63 = vpop.f32.mrb[5].mxu0 }
  0xe3   :  { %v1124_v1 = vpop.f32.mrb[6].mxu0 }
  0xe4   :  { %v1126_v3 = vpop.f32.mrb[7].mxu0 }
  0xec   :  { %v954_v23 = vpop.eup %953 }
  0xed   :  { %v224_v24 = vmul.f32 0.5, %v954_v23 }
  0xef   :  { %v225_v25 = vadd.f32 0.5, %v224_v24 }
 0x152   :  { %v232_v26 = vpop.permute.xlu0 %231 }
 0x153   :  { %v234_v27 = vmul.f32 %v232_v26, %v225_v25 }
 0x155   :  { %236 = vrot.lane.b32.xlu1 %v234_v27, %s991_s12 }
 0x1c7   :  { %v237_v28 = vpop.permute.xlu1 %236 }
 0x1c8   :  { %v239_v29 = vadd.f32 %v237_v28, %v126_v20 }
 0x1ca   :  { %955 = vtanh.f32 %v239_v29 }
 0x1d4   :  { %v956_v30 = vpop.eup %955 }
 0x1d5   :  { %v241_v31 = vsub.f32 0.0, %v956_v30 }
 0x1d7   :  { %243 = vrot.lane.b32.xlu1 %v241_v31, %s993_s13 }
 0x249   :  { %v244_v32 = vpop.permute.xlu1 %243 }
 0x24a   :  { %v246_v33 = vmul.f32 %v244_v32, %v225_v25 }
 0x24c   :  { %248 = vrot.lane.b32.xlu0 %v246_v33, %s994_s3 }
 0x2be   :  { %v249_v34 = vpop.permute.xlu0 %248 }
 0x2bf   :  { %v251_v35 = vadd.f32 %v956_v30, %v249_v34 }
 0x2c1   :  { %v253_v36 = vpack.c.bf16 %v251_v35, %v251_v35 }
 0x2c3   :  { %255 = vrot.lane.b32.xlu1 %v253_v36, %s991_s12 }
 0x335   :  { %v256_v37 = vpop.permute.xlu1 %255 }
 0x336   :  { %889 = vmatmul.mubr.msk.bf16.vlgmr.msra.gmra.mrb[4].mxu1 %vm177_vm3, %v256_v37  ;;  %v137_v37 = vadd.f32 %v1080_v11, %v1089_v19 }
 0x337   :  { %901 = vmatpush3.bf16.msra.mxu1 %v1044_v2  ;;  %904 = vmatprep.mubr.msk.bf16.mxu1 %vm990_vm2, %v989_v0 }
 0x338   :  { %902 = vmatprep.subr.bf16.mxu1 %v989_v0 }
 0x33b   :  { %903 = vmatpush3.bf16.msra.mxu1 %v1059_v6 }
 0x33c   :  { %916 = vmatprep.subr.bf16.mxu1 %v989_v0 }
 0x409   :  { %v294_v38 = vpop.f32.mrb[4].mxu1 }
 0x40a   :  { %v305_v39 = vadd.f32 %v294_v38, %v1082_v12  ;;  %v890_v40 = vpop.f32.mrb[5].mxu1  ;;  %v300_v44 = vadd.f32 %v294_v38, %v129_v43 }
 0x40b   :  { %v297_v41 = vpop.f32.mrb[6].mxu1 }
 0x40c   :  { %307 = vrot.lane.b32.xlu0 %v305_v39, %s991_s12  ;;  %v891_v42 = vpop.f32.mrb[7].mxu1  ;;  %v301_v45 = vmul.f32 0.5, %v300_v44 }
 0x40e   :  { %957 = vtanh.f32 %v301_v45 }
 0x418   :  { %v958_v46 = vpop.eup %957 }
 0x419   :  { %v303_v47 = vmul.f32 0.5, %v958_v46 }
 0x41b   :  { %v304_v48 = vadd.f32 0.5, %v303_v47 }
 0x47e   :  { %v308_v49 = vpop.permute.xlu0 %307 }
 0x47f   :  { %v310_v50 = vmul.f32 %v308_v49, %v304_v48 }
 0x481   :  { %312 = vrot.lane.b32.xlu1 %v310_v50, %s991_s12 }
 0x4f3   :  { %v313_v51 = vpop.permute.xlu1 %312 }
 0x4f4   :  { %v315_v52 = vadd.f32 %v313_v51, %v129_v43 }
 0x4f6   :  { %959 = vtanh.f32 %v315_v52 }
 0x500   :  { %v960_v53 = vpop.eup %959 }
 0x501   :  { %v317_v54 = vsub.f32 %v251_v35, %v960_v53 }
 0x503   :  { %319 = vrot.lane.b32.xlu0 %v317_v54, %s993_s13 }
 0x575   :  { %v320_v57 = vpop.permute.xlu0 %319 }
 0x576   :  { %v322_v58 = vmul.f32 %v320_v57, %v304_v48 }
 0x578   :  { %324 = vrot.lane.b32.xlu1 %v322_v58, %s994_s3 }
 0x5ea   :  { %v325_v59 = vpop.permute.xlu1 %324 }
 0x5eb   :  { %v327_v60 = vadd.f32 %v960_v53, %v325_v59  ;;  %v142_v59 = vadd.f32 %v1089_v19, %v1122_v63 }
 0x5ed   :  { %v329_v61 = vpack.c.bf16 %v327_v60, %v327_v60 }
 0x5ef   :  { %331 = vrot.lane.b32.xlu0 %v329_v61, %s991_s12 }
 0x661   :  { %v332_v4 = vpop.permute.xlu0 %331 }
 0x662   :  { %897 = vmatmul.mubr.msk.bf16.vlgmr.msra.gmra.mrb[8].mxu0 %vm177_vm3, %v332_v4 }
 0x663   :  { %909 = vmatpush3.bf16.msra.mxu0 %v1044_v2  ;;  %912 = vmatprep.mubr.msk.bf16.mxu0 %vm990_vm2, %v989_v0 }
 0x664   :  { %910 = vmatprep.subr.bf16.mxu0 %v989_v0 }
 0x667   :  { %911 = vmatpush3.bf16.msra.mxu0 %v1059_v6 }
 0x668   :  { %924 = vmatprep.subr.bf16.mxu0 %v989_v0 }
 0x735   :  { %v370_v5 = vpop.f32.mrb[8].mxu0 }
 0x736   :  { %v381_v7 = vadd.f32 %v370_v5, %v1082_v12  ;;  %v898_v8 = vpop.f32.mrb[9].mxu0  ;;  %v376_v15 = vadd.f32 %v370_v5, %v134_v14 }
 0x737   :  { %v373_v10 = vpop.f32.mrb[10].mxu0 }
 0x738   :  { %383 = vrot.lane.b32.xlu1 %v381_v7, %s991_s12  ;;  %v899_v13 = vpop.f32.mrb[11].mxu0  ;;  %v377_v16 = vmul.f32 0.5, %v376_v15 }
 0x73a   :  { %961 = vtanh.f32 %v377_v16 }
 0x744   :  { %v962_v17 = vpop.eup %961 }
 0x745   :  { %v379_v18 = vmul.f32 0.5, %v962_v17 }
 0x747   :  { %v380_v20 = vadd.f32 0.5, %v379_v18 }
 0x7aa   :  { %v384_v21 = vpop.permute.xlu1 %383 }
 0x7ab   :  { %v386_v22 = vmul.f32 %v384_v21, %v380_v20 }
 0x7ad   :  { %388 = vrot.lane.b32.xlu0 %v386_v22, %s991_s12 }
 0x81f   :  { %v389_v23 = vpop.permute.xlu0 %388 }
 0x820   :  { %v391_v24 = vadd.f32 %v389_v23, %v134_v14 }
 0x822   :  { %963 = vtanh.f32 %v391_v24 }
 0x82c   :  { %v964_v25 = vpop.eup %963 }
 0x82d   :  { %v393_v26 = vsub.f32 %v327_v60, %v964_v25 }
 0x82f   :  { %395 = vrot.lane.b32.xlu1 %v393_v26, %s993_s13 }
 0x8a1   :  { %v396_v27 = vpop.permute.xlu1 %395 }
 0x8a2   :  { %v398_v28 = vmul.f32 %v396_v27, %v380_v20 }
 0x8a4   :  { %400 = vrot.lane.b32.xlu0 %v398_v28, %s994_s3  ;;  %v145_v28 = vadd.f32 %v1089_v19, %v1126_v3 }
 0x916   :  { %v401_v9 = vpop.permute.xlu0 %400 }
 0x917   :  { %v403_v29 = vadd.f32 %v964_v25, %v401_v9 }
 0x919   :  { %v405_v30 = vpack.c.bf16 %v403_v29, %v403_v29 }
 0x91b   :  { %407 = vrot.lane.b32.xlu1 %v405_v30, %s991_s12 }
 0x98d   :  { %v408_v31 = vpop.permute.xlu1 %407 }
 0x98e   :  { %905 = vmatmul.mubr.msk.bf16.vlgmr.msra.gmra.mrb[8].mxu1 %vm177_vm3, %v408_v31 }
 0x98f   :  { %917 = vmatpush3.bf16.msra.mxu1 %v1044_v2  ;;  %920 = vmatprep.mubr.msk.bf16.mxu1 %vm990_vm2, %v989_v0 }
 0x990   :  { %918 = vmatprep.subr.bf16.mxu1 %v989_v0 }
 0x993   :  { %919 = vmatpush3.bf16.msra.mxu1 %v1059_v6 }
 0x994   :  { %932 = vmatprep.subr.bf16.mxu1 %v989_v0 }
 0xa61   :  { %v446_v32 = vpop.f32.mrb[8].mxu1 }
 0xa62   :  { %v457_v33 = vadd.f32 %v446_v32, %v1082_v12  ;;  %v906_v34 = vpop.f32.mrb[9].mxu1  ;;  %v452_v38 = vadd.f32 %v446_v32, %v137_v37 }
 0xa63   :  { %v449_v35 = vpop.f32.mrb[10].mxu1 }
 0xa64   :  { %459 = vrot.lane.b32.xlu0 %v457_v33, %s991_s12  ;;  %v907_v36 = vpop.f32.mrb[11].mxu1  ;;  %v453_v39 = vmul.f32 0.5, %v452_v38 }
 0xa66   :  { %965 = vtanh.f32 %v453_v39 }
 0xa70   :  { %v966_v40 = vpop.eup %965 }
 0xa71   :  { %v455_v41 = vmul.f32 0.5, %v966_v40 }
 0xa73   :  { %v456_v42 = vadd.f32 0.5, %v455_v41 }
 0xad6   :  { %v460_v43 = vpop.permute.xlu0 %459 }
 0xad7   :  { %v462_v44 = vmul.f32 %v460_v43, %v456_v42 }
 0xad9   :  { %464 = vrot.lane.b32.xlu1 %v462_v44, %s991_s12 }
 0xb4b   :  { %v465_v45 = vpop.permute.xlu1 %464 }
 0xb4c   :  { %v467_v46 = vadd.f32 %v465_v45, %v137_v37 }
 0xb4e   :  { %967 = vtanh.f32 %v467_v46  ;;  %v150_v46 = vadd.f32 %v1120_v62, %v1089_v19 }
 0xb58   :  { %v968_v47 = vpop.eup %967 }
 0xb59   :  { %v469_v48 = vsub.f32 %v403_v29, %v968_v47 }
 0xb5b   :  { %471 = vrot.lane.b32.xlu0 %v469_v48, %s993_s13 }
 0xbcd   :  { %v472_v49 = vpop.permute.xlu0 %471 }
 0xbce   :  { %v474_v50 = vmul.f32 %v472_v49, %v456_v42 }
 0xbd0   :  { %476 = vrot.lane.b32.xlu1 %v474_v50, %s994_s3 }
 0xc42   :  { %v477_v11 = vpop.permute.xlu1 %476 }
 0xc43   :  { %v479_v51 = vadd.f32 %v968_v47, %v477_v11 }
 0xc45   :  { %v481_v52 = vpack.c.bf16 %v479_v51, %v479_v51 }
 0xc47   :  { %483 = vrot.lane.b32.xlu0 %v481_v52, %s991_s12 }
 0xcb9   :  { %v484_v53 = vpop.permute.xlu0 %483 }
 0xcba   :  { %913 = vmatmul.mubr.msk.bf16.vlgmr.msra.gmra.mrb[12].mxu0 %vm177_vm3, %v484_v53 }
 0xcbb   :  { %925 = vmatpush3.bf16.msra.mxu0 %v1044_v2  ;;  %928 = vmatprep.mubr.msk.bf16.mxu0 %vm990_vm2, %v989_v0 }
 0xcbc   :  { %926 = vmatprep.subr.bf16.mxu0 %v989_v0 }
 0xcbf   :  { %927 = vmatpush3.bf16.msra.mxu0 %v1059_v6 }
 0xd8d   :  { %v522_v54 = vpop.f32.mrb[12].mxu0 }
 0xd8e   :  { %v533_v55 = vadd.f32 %v522_v54, %v1082_v12  ;;  %v914_v56 = vpop.f32.mrb[13].mxu0  ;;  %v528_v60 = vadd.f32 %v522_v54, %v142_v59 }
 0xd8f   :  { %v525_v57 = vpop.f32.mrb[14].mxu0 }
 0xd90   :  { %535 = vrot.lane.b32.xlu1 %v533_v55, %s991_s12  ;;  %v915_v58 = vpop.f32.mrb[15].mxu0  ;;  %v529_v61 = vmul.f32 0.5, %v528_v60 }
 0xd92   :  { %969 = vtanh.f32 %v529_v61 }
 0xd9c   :  { %v970_v4 = vpop.eup %969 }
 0xd9d   :  { %v531_v5 = vmul.f32 0.5, %v970_v4 }
 0xd9f   :  { %v532_v7 = vadd.f32 0.5, %v531_v5 }
 0xe02   :  { %v536_v8 = vpop.permute.xlu1 %535 }
 0xe03   :  { %v538_v10 = vmul.f32 %v536_v8, %v532_v7 }
 0xe05   :  { %540 = vrot.lane.b32.xlu0 %v538_v10, %s991_s12 }
 0xe77   :  { %v541_v13 = vpop.permute.xlu0 %540 }
 0xe78   :  { %v543_v14 = vadd.f32 %v541_v13, %v142_v59  ;;  %v153_v13 = vadd.f32 %v1124_v1, %v1089_v19  ;;  %v835_v19 = vld [vmem:[%s1220_s5] ss:$0 sm:$0xff] }
 0xe7a   :  { %971 = vtanh.f32 %v543_v14 }
 0xe84   :  { %v972_v15 = vpop.eup %971 }
 0xe85   :  { %v545_v16 = vsub.f32 %v479_v51, %v972_v15 }
 0xe87   :  { %547 = vrot.lane.b32.xlu1 %v545_v16, %s993_s13 }
 0xef9   :  { %v548_v17 = vpop.permute.xlu1 %547 }
 0xefa   :  { %v550_v18 = vmul.f32 %v548_v17, %v532_v7 }
 0xefc   :  { %552 = vrot.lane.b32.xlu0 %v550_v18, %s994_s3 }
 0xf6e   :  { %v553_v63 = vpop.permute.xlu0 %552 }
 0xf6f   :  { %v555_v20 = vadd.f32 %v972_v15, %v553_v63 }
 0xf71   :  { %v557_v21 = vpack.c.bf16 %v555_v20, %v555_v20 }
 0xf73   :  { %559 = vrot.lane.b32.xlu1 %v557_v21, %s991_s12 }
 0xfe5   :  { %v560_v22 = vpop.permute.xlu1 %559 }
 0xfe6   :  { %921 = vmatmul.mubr.msk.bf16.vlgmr.msra.gmra.mrb[12].mxu1 %vm177_vm3, %v560_v22 }
 0xfe7   :  { %933 = vmatpush3.bf16.msra.mxu1 %v1044_v2  ;;  %936 = vmatprep.mubr.msk.bf16.mxu1 %vm990_vm2, %v989_v0 }
 0xfe8   :  { %934 = vmatprep.subr.bf16.mxu1 %v989_v0 }
 0xfeb   :  { %935 = vmatpush3.bf16.msra.mxu1 %v1059_v6 }
0x10b9   :  { %v598_v23 = vpop.f32.mrb[12].mxu1 }
0x10ba   :  { %v609_v24 = vadd.f32 %v598_v23, %v1082_v12  ;;  %v922_v25 = vpop.f32.mrb[13].mxu1  ;;  %v604_v9 = vadd.f32 %v598_v23, %v145_v28 }
0x10bb   :  { %v601_v26 = vpop.f32.mrb[14].mxu1 }
0x10bc   :  { %611 = vrot.lane.b32.xlu0 %v609_v24, %s991_s12  ;;  %v923_v27 = vpop.f32.mrb[15].mxu1  ;;  %v605_v2 = vmul.f32 0.5, %v604_v9 }
0x10be   :  { %973 = vtanh.f32 %v605_v2 }
0x10c8   :  { %v974_v29 = vpop.eup %973 }
0x10c9   :  { %v607_v30 = vmul.f32 0.5, %v974_v29  ;;  %v802_v29 = vstv %s1221_s6 }
0x10cb   :  { %v608_v31 = vadd.f32 0.5, %v607_v30 }
0x112e   :  { %v612_v0 = vpop.permute.xlu0 %611 }
0x112f   :  { %v614_v32 = vmul.f32 %v612_v0, %v608_v31 }
0x1131   :  { %616 = vrot.lane.b32.xlu1 %v614_v32, %s991_s12 }
0x11a3   :  { %v617_v6 = vpop.permute.xlu1 %616 }
0x11a4   :  { %v619_v33 = vadd.f32 %v617_v6, %v145_v28 }
0x11a6   :  { %975 = vtanh.f32 %v619_v33 }
0x11b0   :  { %v976_v34 = vpop.eup %975 }
0x11b1   :  { %v621_v35 = vsub.f32 %v555_v20, %v976_v34 }
0x11b3   :  { %623 = vrot.lane.b32.xlu0 %v621_v35, %s993_s13 }
0x1225   :  { %v624_v36 = vpop.permute.xlu0 %623 }
0x1226   :  { %v626_v37 = vmul.f32 %v624_v36, %v608_v31 }
0x1228   :  { %628 = vrot.lane.b32.xlu1 %v626_v37, %s994_s3 }
0x129a   :  { %v629_v3 = vpop.permute.xlu1 %628 }
0x129b   :  { %v631_v38 = vadd.f32 %v976_v34, %v629_v3 }
0x129d   :  { %v633_v39 = vpack.c.bf16 %v631_v38, %v631_v38 }
0x129f   :  { %635 = vrot.lane.b32.xlu0 %v633_v39, %s991_s12 }
0x1311   :  { %v636_v40 = vpop.permute.xlu0 %635 }
0x1312   :  { %929 = vmatmul.mubr.msk.bf16.vlgmr.msra.gmra.mrb[16].mxu0 %vm177_vm3, %v636_v40 }
0x13e5   :  { %v674_v41 = vpop.f32.mrb[16].mxu0 }
0x13e6   :  { %v685_v42 = vadd.f32 %v674_v41, %v1082_v12  ;;  %v930_v43 = vpop.f32.mrb[17].mxu0  ;;  %v680_v47 = vadd.f32 %v674_v41, %v150_v46 }
0x13e7   :  { %v677_v44 = vpop.f32.mrb[18].mxu0 }
0x13e8   :  { %687 = vrot.lane.b32.xlu1 %v685_v42, %s991_s12  ;;  %v931_v45 = vpop.f32.mrb[19].mxu0  ;;  %v681_v48 = vmul.f32 0.5, %v680_v47 }
0x13ea   :  { %977 = vtanh.f32 %v681_v48 }
0x13f4   :  { %v978_v49 = vpop.eup %977 }
0x13f5   :  { %v683_v50 = vmul.f32 0.5, %v978_v49 }
0x13f7   :  { %v684_v11 = vadd.f32 0.5, %v683_v50 }
0x145a   :  { %v688_v51 = vpop.permute.xlu1 %687 }
0x145b   :  { %v690_v52 = vmul.f32 %v688_v51, %v684_v11 }
0x145d   :  { %692 = vrot.lane.b32.xlu0 %v690_v52, %s991_s12 }
0x14cf   :  { %v693_v53 = vpop.permute.xlu0 %692 }
0x14d0   :  { %v695_v54 = vadd.f32 %v693_v53, %v150_v46 }
0x14d2   :  { %979 = vtanh.f32 %v695_v54 }
0x14dc   :  { %v980_v55 = vpop.eup %979 }
0x14dd   :  { %v697_v56 = vsub.f32 %v631_v38, %v980_v55 }
0x14df   :  { %699 = vrot.lane.b32.xlu1 %v697_v56, %s993_s13 }
0x1551   :  { %v700_v57 = vpop.permute.xlu1 %699 }
0x1552   :  { %v702_v58 = vmul.f32 %v700_v57, %v684_v11 }
0x1554   :  { %704 = vrot.lane.b32.xlu0 %v702_v58, %s994_s3 }
0x15c6   :  { %v705_v62 = vpop.permute.xlu0 %704 }
0x15c7   :  { %v707_v59 = vadd.f32 %v980_v55, %v705_v62 }
0x15c9   :  { %v709_v60 = vpack.c.bf16 %v707_v59, %v707_v59 }
0x15cb   :  { %711 = vrot.lane.b32.xlu1 %v709_v60, %s991_s12 }
0x163d   :  { %v712_v61 = vpop.permute.xlu1 %711 }
0x163e   :  { %937 = vmatmul.mubr.msk.bf16.vlgmr.msra.gmra.mrb[16].mxu1 %vm177_vm3, %v712_v61 }
0x1711   :  { %v750_v4 = vpop.f32.mrb[16].mxu1 }
0x1712   :  { %v761_v5 = vadd.f32 %v750_v4, %v1082_v12  ;;  %v938_v7 = vpop.f32.mrb[17].mxu1  ;;  %v756_v14 = vadd.f32 %v750_v4, %v153_v13 }
0x1713   :  { %v753_v8 = vpop.f32.mrb[18].mxu1 }
0x1714   :  { %763 = vrot.lane.b32.xlu0 %v761_v5, %s991_s12  ;;  %v939_v10 = vpop.f32.mrb[19].mxu1  ;;  %v757_v15 = vmul.f32 0.5, %v756_v14 }
0x1716   :  { %981 = vtanh.f32 %v757_v15 }
0x1720   :  { %v982_v16 = vpop.eup %981 }
0x1721   :  { %v759_v17 = vmul.f32 0.5, %v982_v16 }
0x1723   :  { %v760_v18 = vadd.f32 0.5, %v759_v17 }
0x1786   :  { %v764_v63 = vpop.permute.xlu0 %763 }
0x1787   :  { %v766_v20 = vmul.f32 %v764_v63, %v760_v18 }
0x1789   :  { %768 = vrot.lane.b32.xlu1 %v766_v20, %s991_s12 }
0x17fb   :  { %v769_v21 = vpop.permute.xlu1 %768 }
0x17fc   :  { %v771_v12 = vadd.f32 %v769_v21, %v153_v13 }
0x17fe   :  { %983 = vtanh.f32 %v771_v12 }
0x1808   :  { %v984_v22 = vpop.eup %983 }
0x1809   :  { %v773_v23 = vsub.f32 %v707_v59, %v984_v22 }
0x180b   :  { %775 = vrot.lane.b32.xlu0 %v773_v23, %s993_s13 }
0x180f   :  { %790 = vrot.lane.b32.xlu0 %v835_v19, %s991_s12 }
0x187d   :  { %v776_v1 = vpop.permute.xlu0 %775 }
0x187e   :  { %v778_v24 = vmul.f32 %v776_v1, %v760_v18 }
0x1880   :  { %780 = vrot.lane.b32.xlu1 %v778_v24, %s994_s3 }
0x1881   :  { %v791_v26 = vpop.permute.xlu0 %790 }
0x18f2   :  { %v781_v25 = vpop.permute.xlu1 %780 }
0x18f3   :  { %v783_v27 = vadd.f32 %v984_v22, %v781_v25 }
0x18f5   :  { %v793_v28 = vmul.f32 %v791_v26, %v783_v27 }
0x18f7   :  { %795 = vrot.lane.b32.xlu1 %v793_v28, %s991_s12 }
0x1969   :  { %v796_v9 = vpop.permute.xlu1 %795 }
0x196a   :  { %v798_v2 = vsel %vm177_vm3, %v796_v9, 0.0 }
0x196b   :  { %799 = vadd.xlane.f32.xlu0 %v798_v2 }
0x19f8   :  { %v800_v30 = vpop.xlane.xlu0 %799 }
0x19f9   :  { %v803_v31 = vadd.f32 %v802_v29, %v800_v30 }
0x19fb   :  { %v836_v0 = vmul.f32 -1.442695, %v803_v31 }
0x19fd   :  { %985 = vpow2.f32 %v836_v0 }
0x1a07   :  { %v986_v32 = vpop.eup %985 }
0x1a08   :  { %v807_v6 = vadd.f32 1.0, %v986_v32 }
0x1a0a   :  { %987 = vrcp.f32 %v807_v6 }
0x1a14   :  { %v988_v33 = vpop.eup %987 }
0x1a15   :  { %811 = vst.msk [vmem:[%s1222_s7] sm:$0xff] %vm810_vm4, %v988_v33 }

</bundles_post_ra>
